<compile_context>
chip_gen: v6e
topology: v6e:2x2x1
jax: 0.10.0
libtpu: 0.0.40
codegen_flags: <defaults>
</compile_context>

<pallas_src>
import jax
import jax.numpy as jnp
from jax.experimental import pallas as pl
from jax.experimental.pallas import tpu as pltpu


def _round_up(n, m):
    return ((n + m - 1) // m) * m


def _cdiv(a, b):
    return (a + b - 1) // b


def critic_kernel(x_ref, w1t_ref, b1_ref, w2t_ref, b2_ref, w3t_ref, b3_ref, o_ref):
    """One batch tile: x (TM, F)  ->  value row (1, TM), feature-major inside."""
    md = w1t_ref.dtype                      # matmul operand dtype (bf16 or f32)
    x = x_ref[...]                          # (TM, F): single HBM pass, f32 as stored
    if x.dtype != md:
        x = x.astype(md)                    # in-kernel cast; no wrapper-side HBM pass

    # fc1 + tanh: contract (H, F) with (TM, F) along F -> (H, TM) feature-major
    # (lane-dense activations; bias broadcast along lanes; f32 accumulate).
    h1 = jnp.tanh(
        jax.lax.dot_general(
            w1t_ref[...], x,
            dimension_numbers=(((1,), (1,)), ((), ())),
            preferred_element_type=jnp.float32,
        ) + b1_ref[...]
    )                                       # (H, TM) f32

    # fc2 + tanh: (H, H) @ (H, TM) -> (H, TM)
    h2 = jnp.tanh(
        jnp.dot(w2t_ref[...], h1.astype(md), preferred_element_type=jnp.float32)
        + b2_ref[...]
    )                                       # (H, TM) f32

    # fc3 head: (1, H) @ (H, TM) -> (1, TM): lane-dense output row; f32 weights
    # (fc3.weight is 0.1-scaled, keep exact).  b3 is a scalar from SMEM.
    v = jnp.dot(w3t_ref[...], h2, preferred_element_type=jnp.float32) + b3_ref[0]
    o_ref[...] = v.astype(o_ref.dtype)


def critic_forward(x, params, *, block_rows=8192, matmul_dtype=jnp.bfloat16):
    """Forward pass of the Critic MLP.  x: (B, num_inputs) f32 -> (B, 1) f32."""
    w1, b1, w2, b2, w3, b3 = params
    B, F = x.shape
    H = w1.shape[1]

    # ---- batch tiling --------------------------------------------------------
    tm = min(int(block_rows), _round_up(B, 128))
    tm = max(128, _round_up(tm, 128))             # lane-dense (1, tm) output slabs
    if B > 256 and _cdiv(B, tm) < 2:
        # >= 2 grid steps so v7x's two TensorCores both get work ("parallel" axis);
        # an extra ~0.35us step on single-TC chips is negligible.
        tm = _round_up(_cdiv(B, 2), 128)
    grid = _cdiv(B, tm)

    x_in = x
    if grid == 1:
        # Single (possibly tiny) tile: size it exactly (sublane multiple of 8) so
        # there are no oversize edge blocks; pad at most 7 rows.
        tm = _round_up(B, 8)
        if tm > B:
            x_in = jnp.pad(x, ((0, tm - B), (0, 0)))
    b_pad = grid * tm
    # For grid > 1 the ragged last x tile (if any) is handled by Pallas' partial
    # edge-block DMA; garbage rows only affect output columns >= B (sliced off).

    # ---- one-time weight prep (tiny arrays; feature-major / transposed) -------
    w1t = w1.T.astype(matmul_dtype)               # (H, F)   VMEM-resident
    w2t = w2.T.astype(matmul_dtype)               # (H, H)   VMEM-resident
    b1c = b1.reshape(H, 1).astype(jnp.float32)    # (H, 1)   bias columns
    b2c = b2.reshape(H, 1).astype(jnp.float32)
    w3t = w3.reshape(H, 1).T.astype(jnp.float32)  # (1, H)   f32 head
    b3s = b3.reshape(-1).astype(jnp.float32)      # (1,)     SMEM scalar

    in_itemsize = int(x.dtype.itemsize)
    w_itemsize = int(jnp.dtype(matmul_dtype).itemsize)
    cost = pl.CostEstimate(
        flops=int(2 * b_pad * (F * H + H * H + H)),
        transcendentals=int(2 * b_pad * H),
        bytes_accessed=int(B * F * in_itemsize + b_pad * 4
                           + (F * H + H * H) * w_itemsize + (3 * H + 1) * 4),
    )

    # VMEM budget: double-buffered x tiles + out slabs + resident weights + f32
    # activation scratch; clamp below v7x's 64 MiB/TC so one kernel fits everywhere.
    vmem_est = (2 * tm * F * in_itemsize + 2 * tm * 4
                + (F * H + H * H) * w_itemsize + 6 * tm * H * 4 + (1 << 20))
    vmem_limit = int(min(max(vmem_est, 32 << 20), 56 << 20))

    out_row = pl.pallas_call(
        critic_kernel,
        out_shape=jax.ShapeDtypeStruct((1, b_pad), jnp.float32),
        grid_spec=pltpu.PrefetchScalarGridSpec(
            num_scalar_prefetch=0,
            grid=(grid,),
            in_specs=[
                pl.BlockSpec((tm, F), lambda i: (i, 0)),             # x: streamed tiles
                pl.BlockSpec((H, F), lambda i: (0, 0)),              # w1^T: resident
                pl.BlockSpec((H, 1), lambda i: (0, 0)),              # b1 column
                pl.BlockSpec((H, H), lambda i: (0, 0)),              # w2^T: resident
                pl.BlockSpec((H, 1), lambda i: (0, 0)),              # b2 column
                pl.BlockSpec((1, H), lambda i: (0, 0)),              # w3^T row (f32)
                pl.BlockSpec(memory_space=pltpu.MemorySpace.SMEM),   # b3 scalar
            ],
            out_specs=pl.BlockSpec((1, tm), lambda i: (0, i)),       # lane-dense slab
        ),
        compiler_params=pltpu.CompilerParams(
            dimension_semantics=("parallel",),   # shard batch tiles across TCs (v7x)
            vmem_limit_bytes=vmem_limit,
        ),
        cost_estimate=cost,
    )(x_in, w1t, b1c, w2t, b2c, w3t, b3s)

    # Keep the module's (B, 1) output contract.
    return out_row[0, :B].reshape(B, 1)


def init_critic_params(key, num_inputs, hidden_size):
    """PyTorch nn.Linear default init (U(-1/sqrt(fan_in), 1/sqrt(fan_in))),
    with fc3.weight *= 0.1 and fc3.bias *= 0, matching the module.
    Weights are stored as [in, out] (transposed vs PyTorch's [out, in])."""
    ks = jax.random.split(key, 6)

    def linear(kw, kb, fan_in, fan_out):
        bound = 1.0 / jnp.sqrt(jnp.float32(fan_in))
        w = jax.random.uniform(kw, (fan_in, fan_out), jnp.float32, -bound, bound)
        b = jax.random.uniform(kb, (1, fan_out), jnp.float32, -bound, bound)
        return w, b

    w1, b1 = linear(ks[0], ks[1], num_inputs, hidden_size)
    w2, b2 = linear(ks[2], ks[3], hidden_size, hidden_size)
    w3, b3 = linear(ks[4], ks[5], hidden_size, 1)
    w3 = w3 * 0.1   # self.fc3.weight.data.mul_(0.1)
    b3 = b3 * 0.0   # self.fc3.bias.data.mul_(0.0)
    return (w1, b1, w2, b2, w3, b3)


def critic_reference(x, params, matmul_dtype=jnp.float32):
    """Pure-JAX reference. With matmul_dtype=bf16 it mirrors the kernel's casts."""
    w1, b1, w2, b2, w3, b3 = params
    hi = jax.lax.Precision.HIGHEST
    md = matmul_dtype
    h1 = jnp.tanh(jnp.dot(x.astype(md), w1.astype(md),
                          preferred_element_type=jnp.float32, precision=hi) + b1)
    h2 = jnp.tanh(jnp.dot(h1.astype(md), w2.astype(md),
                          preferred_element_type=jnp.float32, precision=hi) + b2)
    return jnp.dot(h2, w3, preferred_element_type=jnp.float32, precision=hi) + b3


if __name__ == "__main__":
    num_inputs = 16    # e.g. MuJoCo state dim
    hidden_size = 32   # args.hidden_size

    key = jax.random.PRNGKey(0)
    k_params, k_x1, k_x2 = jax.random.split(key, 3)
    params = init_critic_params(k_params, num_inputs, hidden_size)

    # --- small batch: single exact tile (grid=1) ------------------------------
    x_small = jax.random.normal(k_x1, (8, num_inputs), jnp.float32)
    v_small = critic_forward(x_small, params)
    jax.block_until_ready(v_small)
    assert v_small.shape == (8, 1)
    ref_small_bf16 = critic_reference(x_small, params, matmul_dtype=jnp.bfloat16)
    ref_small_f32 = critic_reference(x_small, params, matmul_dtype=jnp.float32)
    assert jnp.allclose(v_small, ref_small_bf16, atol=2e-3, rtol=1e-2), \
        "mismatch vs bf16-matched reference"
    assert jnp.allclose(v_small, ref_small_f32, atol=1e-2, rtol=5e-2), \
        "mismatch vs f32 reference"

    # --- exact-f32 matmul path -------------------------------------------------
    v_small_f32 = critic_forward(x_small, params, matmul_dtype=jnp.float32)
    jax.block_until_ready(v_small_f32)
    assert jnp.allclose(v_small_f32, ref_small_f32, atol=2e-3, rtol=1e-2), \
        "mismatch vs f32 reference (f32 matmul path)"

    # --- multi-step batch grid with a ragged last tile (no wrapper-side pad) ---
    x_big = jax.random.normal(k_x2, (300, num_inputs), jnp.float32)
    ref_big = critic_reference(x_big, params, matmul_dtype=jnp.bfloat16)

    v_big = critic_forward(x_big, params, block_rows=128)   # tm=128, grid=3
    jax.block_until_ready(v_big)
    assert v_big.shape == (300, 1)
    assert jnp.allclose(v_big, ref_big, atol=2e-3, rtol=1e-2), \
        "mismatch vs bf16-matched reference (gridded path)"

    v_big2 = critic_forward(x_big, params)                  # ensure-2-steps path: tm=256, grid=2
    jax.block_until_ready(v_big2)
    assert jnp.allclose(v_big2, ref_big, atol=2e-3, rtol=1e-2), \
        "mismatch vs bf16-matched reference (2-step path)"

    print("KERNEL_OK")
</pallas_src>

<mosaic_0001>
module attributes {stable_mosaic.version = 11 : i64} {
  func.func @critic_kernel(%arg0: i32, %arg1: memref<8x16xf32, #tpu.memory_space<vmem>>, %arg2: memref<32x16xbf16, #tpu.memory_space<vmem>>, %arg3: memref<32x1xf32, #tpu.memory_space<vmem>>, %arg4: memref<32x32xbf16, #tpu.memory_space<vmem>>, %arg5: memref<32x1xf32, #tpu.memory_space<vmem>>, %arg6: memref<1x32xf32, #tpu.memory_space<vmem>>, %arg7: memref<1xf32, #tpu.memory_space<smem>>, %arg8: memref<1x8xf32, #tpu.memory_space<vmem>>) attributes {dimension_semantics = [#tpu.dimension_semantics<parallel>], iteration_bounds = array<i64: 1>, scalar_prefetch = 0 : i64, scratch_operands = 0 : i64, tpu.core_type = #tpu.core_type<tc>, window_params = [{transform_indices = @transform_0, window_bounds = array<i64: 8, 16>}, {pipeline_mode = #tpu.pipeline_mode<synchronous>, transform_indices = @transform_1, window_bounds = array<i64: 32, 16>}, {pipeline_mode = #tpu.pipeline_mode<synchronous>, transform_indices = @transform_2, window_bounds = array<i64: 32, 1>}, {pipeline_mode = #tpu.pipeline_mode<synchronous>, transform_indices = @transform_3, window_bounds = array<i64: 32, 32>}, {pipeline_mode = #tpu.pipeline_mode<synchronous>, transform_indices = @transform_4, window_bounds = array<i64: 32, 1>}, {pipeline_mode = #tpu.pipeline_mode<synchronous>, transform_indices = @transform_5, window_bounds = array<i64: 1, 32>}, {transform_indices = @transform_6, window_bounds = array<i64: 1>}, {transform_indices = @transform_7, window_bounds = array<i64: 1, 8>}]} {
    %c0 = arith.constant 0 : index
    %c0_0 = arith.constant 0 : index
    %0 = vector.load %arg1[%c0, %c0_0] : memref<8x16xf32, #tpu.memory_space<vmem>>, vector<8x16xf32>
    %1 = arith.truncf %0 : vector<8x16xf32> to vector<8x16xbf16>
    %c0_1 = arith.constant 0 : index
    %c0_2 = arith.constant 0 : index
    %2 = vector.load %arg2[%c0_1, %c0_2] : memref<32x16xbf16, #tpu.memory_space<vmem>>, vector<32x16xbf16>
    %cst = arith.constant dense<0.000000e+00> : vector<32x8xf32>
    %3 = tpu.matmul %2, %1, %cst {dimension_numbers = #tpu.dot_dimension_numbers<[1], [1], [0], [0], [0, 0, 1, 0], [], []>} : vector<32x16xbf16>, vector<8x16xbf16>, vector<32x8xf32> -> vector<32x8xf32>
    %c0_3 = arith.constant 0 : index
    %c0_4 = arith.constant 0 : index
    %4 = vector.load %arg3[%c0_3, %c0_4] : memref<32x1xf32, #tpu.memory_space<vmem>>, vector<32x1xf32>
    %5 = vector.broadcast %4 : vector<32x1xf32> to vector<32x8xf32>
    %6 = arith.addf %3, %5 : vector<32x8xf32>
    %7 = math.tanh %6 : vector<32x8xf32>
    %c0_5 = arith.constant 0 : index
    %c0_6 = arith.constant 0 : index
    %8 = vector.load %arg4[%c0_5, %c0_6] : memref<32x32xbf16, #tpu.memory_space<vmem>>, vector<32x32xbf16>
    %9 = arith.truncf %7 : vector<32x8xf32> to vector<32x8xbf16>
    %cst_7 = arith.constant dense<0.000000e+00> : vector<32x8xf32>
    %10 = tpu.matmul %8, %9, %cst_7 {dimension_numbers = #tpu.dot_dimension_numbers<[1], [0], [0], [1], [0, 0, 1, 1], [], []>} : vector<32x32xbf16>, vector<32x8xbf16>, vector<32x8xf32> -> vector<32x8xf32>
    %c0_8 = arith.constant 0 : index
    %c0_9 = arith.constant 0 : index
    %11 = vector.load %arg5[%c0_8, %c0_9] : memref<32x1xf32, #tpu.memory_space<vmem>>, vector<32x1xf32>
    %12 = vector.broadcast %11 : vector<32x1xf32> to vector<32x8xf32>
    %13 = arith.addf %10, %12 : vector<32x8xf32>
    %14 = math.tanh %13 : vector<32x8xf32>
    %c0_10 = arith.constant 0 : index
    %c0_11 = arith.constant 0 : index
    %15 = vector.load %arg6[%c0_10, %c0_11] : memref<1x32xf32, #tpu.memory_space<vmem>>, vector<1x32xf32>
    %cst_12 = arith.constant dense<0.000000e+00> : vector<1x8xf32>
    %16 = tpu.matmul %15, %14, %cst_12 {dimension_numbers = #tpu.dot_dimension_numbers<[1], [0], [0], [1], [0, 0, 1, 1], [], []>} : vector<1x32xf32>, vector<32x8xf32>, vector<1x8xf32> -> vector<1x8xf32>
    %c0_13 = arith.constant 0 : index
    %17 = memref.load %arg7[%c0_13] : memref<1xf32, #tpu.memory_space<smem>>
    %18 = vector.broadcast %17 : f32 to vector<1x8xf32>
    %19 = arith.addf %16, %18 : vector<1x8xf32>
    %c0_14 = arith.constant 0 : index
    %c0_15 = arith.constant 0 : index
    %20 = vector.load %arg8[%c0_14, %c0_15] : memref<1x8xf32, #tpu.memory_space<vmem>>, vector<1x8xf32>
    tpu.vector_store %arg8[%c0_14, %c0_15], %19 {strides = array<i32>} : memref<1x8xf32, #tpu.memory_space<vmem>>, vector<1x8xf32>,
    return
  }
  func.func @transform_0(%arg0: i32) -> (i32, i32) {
    %c0_i32 = arith.constant 0 : i32
    %c0_i32_0 = arith.constant 0 : i32
    return %arg0, %c0_i32 : i32, i32
  }
  func.func @transform_1(%arg0: i32) -> (i32, i32) {
    %c0_i32 = arith.constant 0 : i32
    %c0_i32_0 = arith.constant 0 : i32
    %c0_i32_1 = arith.constant 0 : i32
    return %c0_i32, %c0_i32_0 : i32, i32
  }
  func.func @transform_2(%arg0: i32) -> (i32, i32) {
    %c0_i32 = arith.constant 0 : i32
    %c0_i32_0 = arith.constant 0 : i32
    %c0_i32_1 = arith.constant 0 : i32
    return %c0_i32, %c0_i32_0 : i32, i32
  }
  func.func @transform_3(%arg0: i32) -> (i32, i32) {
    %c0_i32 = arith.constant 0 : i32
    %c0_i32_0 = arith.constant 0 : i32
    %c0_i32_1 = arith.constant 0 : i32
    return %c0_i32, %c0_i32_0 : i32, i32
  }
  func.func @transform_4(%arg0: i32) -> (i32, i32) {
    %c0_i32 = arith.constant 0 : i32
    %c0_i32_0 = arith.constant 0 : i32
    %c0_i32_1 = arith.constant 0 : i32
    return %c0_i32, %c0_i32_0 : i32, i32
  }
  func.func @transform_5(%arg0: i32) -> (i32, i32) {
    %c0_i32 = arith.constant 0 : i32
    %c0_i32_0 = arith.constant 0 : i32
    %c0_i32_1 = arith.constant 0 : i32
    return %c0_i32, %c0_i32_0 : i32, i32
  }
  func.func @transform_6(%arg0: i32) -> i32 {
    %c0_i32 = arith.constant 0 : i32
    %c0_i32_0 = arith.constant 0 : i32
    return %c0_i32 : i32
  }
  func.func @transform_7(%arg0: i32) -> (i32, i32) {
    %c0_i32 = arith.constant 0 : i32
    %c0_i32_0 = arith.constant 0 : i32
    return %c0_i32, %arg0 : i32, i32
  }
}

</mosaic_0001>

<bundles_post_ra>
// kernel: tpu_custom_call.1
= control target key start
LH: loop header
LB: loop body
LE: loop exit
PB: predicated region body
PF: predicated region fallthrough
CT: control target
= control target key end

     0   :  { %vm69_vm0 = vcmask 130048   ;;  %v419_v3 = vmov 0   ;;  %s518_s0 = inlined_call_operand.vmem [shape: f32[8,16], index: 0, kind: input, shape index: {}]   ;;  %s519_s1 = inlined_call_operand.vmem [shape: bf16[32,16], index: 1, kind: input, shape index: {}]   ;;  %s520_s2 = inlined_call_operand.vmem [shape: f32[32,1], index: 2, kind: input, shape index: {}]   ;;  %s521_s3 = inlined_call_operand.vmem [shape: bf16[32,32], index: 3, kind: input, shape index: {}]   ;;  %s522_s4 = inlined_call_operand.vmem [shape: f32[32,1], index: 4, kind: input, shape index: {}]   ;;  %s523_s5 = inlined_call_operand.vmem [shape: f32[1,32], index: 5, kind: input, shape index: {}]   ;;  %s524_s6 = inlined_call_operand.<no memory space> [shape: f32[1], index: 6, kind: input, shape index: {}]   ;;  %s525_s7 = inlined_call_operand.hbm [shape: f32[1,8], index: 7, kind: output, shape index: {}]  }
   0x1   :  { %v29_v0 = vld [vmem:[%s518_s0] sm:$0xff]  ;;  %375 = vset.pattern.permute.xlu0 %v419_v3  ;;  %v37_v4 = vld [vmem:[%s520_s2 + $0x10] sm:$0xff]  ;;  %376 = vset.pattern.permute.xlu1 %v419_v3  ;;  %v38_v7 = vld [vmem:[%s520_s2 + $0x18] sm:$0xff] }
   0x2   :  { %v30_v1 = vpack.c.bf16 %v29_v0, %v29_v0  ;;  %v377_v2 = vld [vmem:[%s519_s1] sm:$0xff]   ;;  %51 = vperm.xlu0 %375, %v37_v4   ;;  %v36_v8 = vld [vmem:[%s520_s2 + $0x8] sm:$0xff] }
   0x3   :  { %347 = vmatprep.mubr.msk.bf16.mxu0 %vm69_vm0, %v377_v2  ;;  %v35_v6 = vld [vmem:[%s520_s2] sm:$0xff] }
   0x4   :  { %370 = vmatprep.subr.msk.bf16.mxu0 %vm69_vm0, %v30_v1  ;;  %v77_v5 = vsel %vm69_vm0, %v30_v1, 0  ;;  %41 = vperm.xlu1 %376, %v35_v6  }
   0x5   :  { %346 = vmatpush3.bf16.xpose.msra.mxu0 %v77_v5 }
   0x6   :  { %13 = vsyncpa [#allocation4], 0  ;;  %v378_v9 = vld [vmem:[%s519_s1 + $0x8] sm:$0xff]   ;;  %56 = vperm.xlu0 %375, %v38_v7   ;;  %v141_v10 = vld [vmem:[%s522_s4 + $0x18] sm:$0xff]  ;;  %vm172_vm1 = vcmask 261120   ;;  %v420_v34 = vmov 0.0   ;;  %v234_v52 = vstv %s524_s6 }
   0x7   :  { %v140_v11 = vld [vmem:[%s522_s4 + $0x10] sm:$0xff]  ;;  %v139_v12 = vld [vmem:[%s522_s4 + $0x8] sm:$0xff]  ;;  %v138_v13 = vld [vmem:[%s522_s4] sm:$0xff]  ;;  %359 = vmatprep.subr.mxu0 %v420_v34  ;;  %vm421_vm2 = vmmov 0   ;;  %s422_s26 = smov [#allocation3]   ;;  %vm308_vm3 = vcmask 57344  }
   0x8   :  { %46 = vperm.xlu1 %376, %v36_v8   ;;  %v379_v14 = vld [vmem:[%s521_s3] sm:$0xff]   ;;  %v380_v33 = vld [vmem:[%s521_s3 + $0x8] sm:$0xff]   ;;  %s316_s27 = sshll.u32 %s422_s26, 4  ;;  %s317_s27 = int_to_ptr.vmem [resolvable:$true] %s316_s27 }
   0x9   :  { %355 = vmatprep.mubr.msk.bf16.mxu1 %vm172_vm1, %v379_v14  ;;  %v232_v50 = vld [vmem:[%s523_s5] sm:$0x1]  ;;  %s397_s28 = scalar_lea.vmem %s317_s27, 16  ;;  %s401_s5 = scalar_lea.vmem %s317_s27, 32 }
   0xa   :  { %159 = vperm.xlu0 %375, %v141_v10   ;;  %p398_p0 = scmp.ne.s32.totalorder %s317_s27, %s397_s28  ;;  %p402_p1 = scmp.lt.s32.totalorder %s317_s27, %s317_s27 }
   0xb   :  { %p403_p2 = scmp.lt.s32.totalorder %s401_s5, %s397_s28 }
   0xc   :  { %348 = vmatmul.mubr.msk.bf16.vlgmr.msra.gmra.mxu0 %vm69_vm0, %v378_v9  ;;  %154 = vperm.xlu1 %376, %v140_v11  }
   0xd   :  { %367 = vmatprep.mubr.msk.f32.mxu0 %vm421_vm2, %v420_v34  ;;  %p404_p3 = por %p403_p2, %p402_p1 }
   0xe   :  { %149 = vperm.xlu0 %375, %v139_v12  }
   0xf   :  { %p405_p4 = pnand %p404_p3, %p398_p0 }
  0x10   :  { %144 = vperm.xlu1 %376, %v138_v13  }
  0x7d   :  { %v52_v15 = vpop.permute.xlu0 %51 }
  0x7f   :  { %v42_v16 = vpop.permute.xlu1 %41 }
  0x81   :  { %v57_v20 = vpop.permute.xlu0 %56 }
  0x83   :  { %v47_v24 = vpop.permute.xlu1 %46 }
  0x85   :  { %v160_v35 = vpop.permute.xlu0 %159 }
  0x87   :  { %v155_v37 = vpop.permute.xlu1 %154 }
  0x89   :  { %v150_v42 = vpop.permute.xlu0 %149 }
  0x8b   :  { %v145_v45 = vpop.permute.xlu1 %144 }
  0xcc   :  { %v349_v17 = vpop.f32.mrf.mxu0 }
  0xcd   :  { %v122_v18 = vadd.f32 %v349_v17, %v52_v15 }
  0xce   :  { %v113_v19 = vpop.f32.mrf.mxu0 }
  0xcf   :  { %v114_v21 = vadd.f32 %v113_v19, %v42_v16  ;;  %381 = vtanh.f32 %v122_v18 }
  0xd0   :  { %v350_v22 = vpop.f32.mrf.mxu0 }
  0xd1   :  { %v125_v23 = vadd.f32 %v350_v22, %v57_v20 }
  0xd2   :  { %v116_v25 = vpop.f32.mrf.mxu0 }
  0xd3   :  { %383 = vtanh.f32 %v125_v23  ;;  %v117_v26 = vadd.f32 %v116_v25, %v47_v24 }
  0xd4   :  { %385 = vtanh.f32 %v114_v21 }
  0xd5   :  { %387 = vtanh.f32 %v117_v26 }
  0xdc   :  { %v382_v27 = vpop.eup %381 }
  0xe0   :  { %v384_v28 = vpop.eup %383 }
  0xe1   :  { %v386_v29 = vpop.eup %385  ;;  %v137_v30 = vpack.c.bf16 %v384_v28, %v382_v27 }
  0xe2   :  { %v388_v31 = vpop.eup %387 }
  0xe3   :  { %351 = vmatprep.subr.bf16.mxu1 %v137_v30  ;;  %v136_v32 = vpack.c.bf16 %v388_v31, %v386_v29 }
  0xe4   :  { %352 = vmatpush3.bf16.msra.mxu1 %v137_v30 }
  0xe5   :  { %353 = vmatprep.subr.bf16.mxu1 %v136_v32 }
  0xe8   :  { %354 = vmatpush3.bf16.msra.mxu1 %v136_v32 }
  0xeb   :  { %356 = vmatmul.mubr.msk.bf16.vlgmr.msra.gmra.mxu1 %vm172_vm1, %v380_v33 }
 0x1ab   :  { %v357_v36 = vpop.f32.mrf.mxu1 }
 0x1ac   :  { %v222_v40 = vadd.f32 %v357_v36, %v155_v37 }
 0x1ad   :  { %v213_v38 = vpop.f32.mrf.mxu1 }
 0x1ae   :  { %v214_v46 = vadd.f32 %v213_v38, %v145_v45 }
 0x1af   :  { %v358_v39 = vpop.f32.mrf.mxu1 }
 0x1b0   :  { %v225_v41 = vadd.f32 %v358_v39, %v160_v35 }
 0x1b1   :  { %v216_v43 = vpop.f32.mrf.mxu1 }
 0x1b2   :  { %389 = vtanh.f32 %v225_v41  ;;  %v217_v44 = vadd.f32 %v216_v43, %v150_v42 }
 0x1b3   :  { %391 = vtanh.f32 %v222_v40 }
 0x1b4   :  { %393 = vtanh.f32 %v217_v44 }
 0x1b5   :  { %395 = vtanh.f32 %v214_v46 }
 0x1bf   :  { %v390_v47 = vpop.eup %389 }
 0x1c0   :  { %360 = vmatpush3.msra.mxu0 %v390_v47  ;;  %v392_v48 = vpop.eup %391 }
 0x1c1   :  { %361 = vmatprep.subr.mxu0 %v420_v34  ;;  %v394_v49 = vpop.eup %393 }
 0x1c2   :  { %362 = vmatpush3.msra.mxu0 %v392_v48  ;;  %v396_v51 = vpop.eup %395 }
 0x1c3   :  { %363 = vmatprep.subr.mxu0 %v420_v34 }
 0x1c4   :  { %364 = vmatpush3.msra.mxu0 %v394_v49 }
 0x1c5   :  { %365 = vmatprep.subr.mxu0 %v420_v34 }
 0x1c6   :  { %366 = vmatpush3.msra.mxu0 %v396_v51 }
 0x1c7   :  { %368 = vmatmul.mubr.msk.f32.vlgmr.msra.gmra.mxu0 %vm172_vm1, %v232_v50 }
 0x287   :  { %v304_v53 = vpop.f32.mrf.mxu0 }
 0x288   :  { %v305_v54 = vadd.f32 %v304_v53, %v234_v52 }
 0x289   :  { %v369_v55 = vpop.f32.mrf.mxu0 }
 0x28a   :  { %309 = vst.msk [vmem:[#allocation3] sm:$0x1] %vm308_vm3, %v305_v54 }
 0x28b   :  { %408 = shalt.err (!%p405_p4)
}
 0x28c   :  { %319 = dma.vmem_to_hbm [thread:$0]  %s317_s27, 16, %s525_s7, [#allocation4]  }
 0x28d   :  { %417 = dma.done.wait [#allocation4], 16  }
 0x28e   :  { %418 = vsyncadd [#allocation4], 4294967280 }
 0x28f   :  { %323 = vsyncpa [#allocation4], 1 }

</bundles_post_ra>
